<compile_context>
chip_gen: v7x
topology: tpu7x:2x2x1
jax: 0.10.0
libtpu: 0.0.40
codegen_flags: <defaults>
</compile_context>

<pallas_src>
import functools

import numpy as np
import jax
import jax.numpy as jnp
from jax.experimental import pallas as pl
from jax.experimental.pallas import tpu as pltpu


# ----------------------------- configuration -----------------------------
INPUT_DIM = 2          # (x, y) coordinates
OUTPUT_DIM = 3         # e.g. RGB
HIDDEN_DIM = 32
PE_DIM = 4
MLP_LAYERS = 8
SKIP_LAYER = 4         # skip_layers=[4]
USE_TANH = True

ENC_DIM = 2 * INPUT_DIM * PE_DIM              # 16, matches positionalEncoding_vec
MID_LAYERS = (1, 2, 3, 4, 5, 6)               # layers with a 32->32 "h" matmul
B_VALS = tuple(float(2.0 ** j * np.pi) for j in range(PE_DIM))


def _layer_dims():
    dims = []
    for i in range(MLP_LAYERS):
        if i == 0:
            in_d = ENC_DIM
        elif i == SKIP_LAYER:
            in_d = HIDDEN_DIM + ENC_DIM
        else:
            in_d = HIDDEN_DIM
        out_d = OUTPUT_DIM if i == MLP_LAYERS - 1 else HIDDEN_DIM
        dims.append((in_d, out_d))
    return tuple(dims)


LAYER_DIMS = _layer_dims()


def _round_up(a, b):
    return ((a + b - 1) // b) * b


# ------------------------------ Pallas kernel -----------------------------
def _imlp_hash_kernel(x_ref, w0_ref, wmid_ref, w4e_ref, w7_ref, b_ref,
                      out_ref, enc_ref):
    """x_ref: (INPUT_DIM, TM) f32; w0_ref: (32, 16); wmid_ref: (6, 32, 32) for
    layers [1,2,3,4(h-part),5,6]; w4e_ref: (32, 16); w7_ref: (3, 32);
    b_ref: (8, 32, 1) f32; out_ref: (OUTPUT_DIM, TM); enc_ref: (ENC_DIM, TM)
    f32 scratch.  TM sits on the 128-lane axis; weights are pre-transposed so
    every layer is h^T_new = W^T @ h^T with f32 MXU accumulation."""
    cdt = w0_ref.dtype                                   # MXU input dtype (bf16/f32)
    x = x_ref[...]                                       # (2, TM) f32

    # Positional encoding, written in place (no concatenation).  Reference row
    # order per frequency k is [sin(x0 b_k), sin(x1 b_k), cos(x0 b_k),
    # cos(x1 b_k)] with b_k = 2^k * pi, so only sin(pi x)/cos(pi x) hit the
    # EUP; the higher octaves come from the double-angle recurrence (VPU only).
    s = jnp.sin(x * np.pi)
    c = jnp.cos(x * np.pi)
    enc_ref[0:INPUT_DIM, :] = s
    enc_ref[INPUT_DIM:2 * INPUT_DIM, :] = c
    for k in range(1, PE_DIM):
        s, c = 2.0 * s * c, 1.0 - 2.0 * s * s            # sin/cos of doubled angle
        r = 2 * INPUT_DIM * k
        enc_ref[r:r + INPUT_DIM, :] = s
        enc_ref[r + INPUT_DIM:r + 2 * INPUT_DIM, :] = c
    enc = enc_ref[...].astype(cdt)                       # (ENC_DIM, TM)

    # Layer 0.
    h = jnp.dot(w0_ref[...], enc, preferred_element_type=jnp.float32) + b_ref[0]

    # Layers 1..6; the skip layer is two partial matmuls (no concat).
    for j, i in enumerate(MID_LAYERS):
        h = jnp.maximum(h, 0.0)                          # F.relu
        h = jnp.dot(wmid_ref[j], h.astype(cdt),
                    preferred_element_type=jnp.float32)
        if i == SKIP_LAYER:
            h = h + jnp.dot(w4e_ref[...], enc,
                            preferred_element_type=jnp.float32)
        h = h + b_ref[i]

    # Final layer (+ tanh).
    h = jnp.maximum(h, 0.0)
    out = (jnp.dot(w7_ref[...], h.astype(cdt), preferred_element_type=jnp.float32)
           + b_ref[MLP_LAYERS - 1, :OUTPUT_DIM, :])
    if USE_TANH:
        out = jnp.tanh(out)
    out_ref[...] = out.astype(out_ref.dtype)


# ------------------------------ packing -----------------------------------
def pack_params(params, compute_dtype=jnp.bfloat16):
    """Pack / transpose / cast the 8 (w, b) layers once, outside the call path.

    compute_dtype is the MXU input dtype (bf16 -> single-pass matmuls on
    v5e/v6e/v7x; pass jnp.float32 for full-fidelity validation).  Biases stay
    f32 since accumulation is f32."""
    def wT(i):
        return jnp.asarray(params[i][0], jnp.float32).T              # (out, in)

    w4 = jnp.asarray(params[SKIP_LAYER][0], jnp.float32)             # (48, 32): rows [h | enc]
    mids = []
    for i in MID_LAYERS:
        mids.append(w4[:HIDDEN_DIM, :].T if i == SKIP_LAYER else wT(i))
    biases = []
    for i in range(MLP_LAYERS):
        b = jnp.reshape(jnp.asarray(params[i][1], jnp.float32), (-1,))
        biases.append(jnp.pad(b, (0, HIDDEN_DIM - b.shape[0])))
    return dict(
        w0T=wT(0).astype(compute_dtype),                             # (32, 16)
        wmidT=jnp.stack(mids).astype(compute_dtype),                 # (6, 32, 32)
        w4eT=w4[HIDDEN_DIM:, :].T.astype(compute_dtype),             # (32, 16)
        w7T=wT(MLP_LAYERS - 1).astype(compute_dtype),                # (3, 32)
        b=jnp.stack(biases)[:, :, None],                             # (8, 32, 1) f32
    )


# ------------------------------ wrapper -----------------------------------
def _choose_tile(n, tile_cap):
    """Pad n only to a multiple of 128; pick the largest lane tile dividing the
    padded size, respecting tile_cap, with >= 2 grid steps whenever possible
    (v7x has 2 TensorCores and the parallel grid axis shards across them)."""
    n_pad = _round_up(max(n, 1), 128)
    m = n_pad // 128
    min_steps = 2 if m >= 2 else 1
    max_d = max(1, min(tile_cap // 128, m // min_steps))
    d = 1
    for cand in range(max_d, 0, -1):
        if m % cand == 0:
            d = cand
            break
    return n_pad, 128 * d


def imlp_hash_forward(x, packed, *, tile_cap=8192, feature_major=False):
    """x: (N, INPUT_DIM) f32 (or (INPUT_DIM, N) if feature_major).  packed: see
    pack_params.  Returns (N, OUTPUT_DIM), or (OUTPUT_DIM, N) if feature_major
    (skips both wrapper transposes for feature-major consumers)."""
    if feature_major:
        d, n = x.shape
    else:
        n, d = x.shape
    assert d == INPUT_DIM

    n_pad, tile_m = _choose_tile(n, tile_cap)
    xT = (x if feature_major else jnp.transpose(x)).astype(jnp.float32)
    if n_pad != n:
        # Padded tail flows through sin/cos/tanh of zeros (finite), sliced off below.
        xT = jnp.pad(xT, ((0, 0), (0, n_pad - n)))

    grid = (n_pad // tile_m,)
    outT = pl.pallas_call(
        _imlp_hash_kernel,
        out_shape=jax.ShapeDtypeStruct((OUTPUT_DIM, n_pad), jnp.float32),
        grid_spec=pltpu.PrefetchScalarGridSpec(
            num_scalar_prefetch=0,
            grid=grid,
            in_specs=[
                pl.BlockSpec((INPUT_DIM, tile_m), lambda i: (0, i)),
                pl.BlockSpec((HIDDEN_DIM, ENC_DIM), lambda i: (0, 0)),
                pl.BlockSpec((len(MID_LAYERS), HIDDEN_DIM, HIDDEN_DIM),
                             lambda i: (0, 0, 0)),
                pl.BlockSpec((HIDDEN_DIM, ENC_DIM), lambda i: (0, 0)),
                pl.BlockSpec((OUTPUT_DIM, HIDDEN_DIM), lambda i: (0, 0)),
                pl.BlockSpec((MLP_LAYERS, HIDDEN_DIM, 1), lambda i: (0, 0, 0)),
            ],
            out_specs=pl.BlockSpec((OUTPUT_DIM, tile_m), lambda i: (0, i)),
            scratch_shapes=[pltpu.VMEM((ENC_DIM, tile_m), jnp.float32)],
        ),
        compiler_params=pltpu.CompilerParams(
            dimension_semantics=("parallel",)),
        # NOTE(v5e): if tile_cap is ever raised to >= 16K lanes, also set
        # vmem_limit_bytes here (v5e's scoped-VMEM default is only 16 MiB).
    )(xT, packed["w0T"], packed["wmidT"], packed["w4eT"], packed["w7T"],
      packed["b"])

    outT = outT[:, :n]
    return outT if feature_major else jnp.transpose(outT)


# ------------------------- pure-JAX references ------------------------------
def imlp_hash_reference(x, params):
    """Pure-JAX f32 mirror of the PyTorch module (pe_type='encoding', mlp_type='origin')."""
    b = jnp.asarray(B_VALS, dtype=jnp.float32)
    proj = jnp.einsum('ij,k->ijk', x, b)                             # (N, D, pe)
    mapped = jnp.concatenate([jnp.sin(proj), jnp.cos(proj)], 1)      # (N, 2D, pe)
    enc = jnp.transpose(mapped, (0, 2, 1)).reshape(x.shape[0], -1)
    skip_input = enc
    h = enc
    for i, (w, bb) in enumerate(params):
        if i > 0:
            h = jax.nn.relu(h)
        if i == SKIP_LAYER:
            h = jnp.concatenate([h, skip_input], axis=1)
        h = h @ w + bb
    return jnp.tanh(h) if USE_TANH else h


def imlp_hash_emulated_reference(x, packed):
    """Pure-JAX reference mirroring the kernel's math exactly (double-angle
    encoding, split skip-layer weights, compute-dtype MXU inputs with f32
    accumulation) so the Pallas output can be checked tightly."""
    cdt = packed["w0T"].dtype
    xT = jnp.transpose(x).astype(jnp.float32)
    s = jnp.sin(xT * np.pi)
    c = jnp.cos(xT * np.pi)
    rows = [s, c]
    for _ in range(1, PE_DIM):
        s, c = 2.0 * s * c, 1.0 - 2.0 * s * s
        rows += [s, c]
    enc = jnp.concatenate(rows, axis=0).astype(cdt)                  # (ENC_DIM, N)
    h = jnp.dot(packed["w0T"], enc,
                preferred_element_type=jnp.float32) + packed["b"][0]
    for j, i in enumerate(MID_LAYERS):
        h = jnp.maximum(h, 0.0)
        h = jnp.dot(packed["wmidT"][j], h.astype(cdt),
                    preferred_element_type=jnp.float32)
        if i == SKIP_LAYER:
            h = h + jnp.dot(packed["w4eT"], enc,
                            preferred_element_type=jnp.float32)
        h = h + packed["b"][i]
    h = jnp.maximum(h, 0.0)
    out = (jnp.dot(packed["w7T"], h.astype(cdt), preferred_element_type=jnp.float32)
           + packed["b"][MLP_LAYERS - 1, :OUTPUT_DIM, :])
    if USE_TANH:
        out = jnp.tanh(out)
    return jnp.transpose(out)


# ----------------------------- param init ----------------------------------
def init_params(key):
    params = []
    for i in range(MLP_LAYERS):
        in_dim, out_dim = LAYER_DIMS[i]
        key, kw, kb = jax.random.split(key, 3)
        w = jax.random.normal(kw, (in_dim, out_dim), jnp.float32) * (1.0 / np.sqrt(in_dim))
        b = jax.random.normal(kb, (1, out_dim), jnp.float32) * 0.01
        params.append((w, b))
    return params


if __name__ == "__main__":
    key = jax.random.PRNGKey(0)
    key, kx = jax.random.split(key)

    # Small, deterministic example; N deliberately NOT a multiple of 128 so the
    # 128-padding + >=2-step grid path is exercised (pads 200 -> 256, 2 steps).
    N = 200
    x = jax.random.uniform(kx, (N, INPUT_DIM), jnp.float32)
    params = init_params(key)

    ref_f32 = imlp_hash_reference(x, params)

    # --- default perf path: bf16 MXU inputs, f32 accumulation --------------
    packed_bf16 = pack_params(params, jnp.bfloat16)
    fwd = jax.jit(imlp_hash_forward)
    out = jax.block_until_ready(fwd(x, packed_bf16))
    assert out.shape == (N, OUTPUT_DIM)
    # Tight structural check vs a pure-JAX reference using the same mixed-precision math.
    ref_emul = imlp_hash_emulated_reference(x, packed_bf16)
    np.testing.assert_allclose(np.asarray(out), np.asarray(ref_emul),
                               rtol=1.5e-2, atol=1.5e-2)
    # Loose sanity check vs the full-f32 PyTorch-semantics reference
    # (tolerance re-validated for the explicit bf16 MXU inputs).
    np.testing.assert_allclose(np.asarray(out), np.asarray(ref_f32),
                               rtol=1e-1, atol=5e-2)

    # Feature-major I/O path (skips wrapper transposes) must match exactly.
    fwd_fm = jax.jit(functools.partial(imlp_hash_forward, feature_major=True))
    out_fm = jax.block_until_ready(fwd_fm(jnp.transpose(x), packed_bf16))
    np.testing.assert_allclose(np.asarray(out_fm), np.asarray(out).T,
                               rtol=0.0, atol=1e-6)

    # --- f32 MXU-input path, different N to exercise another tile/grid ------
    key, kx2 = jax.random.split(key)
    N2 = 1037                        # pads to 1152 -> tile 384, 3 grid steps
    x2 = jax.random.uniform(kx2, (N2, INPUT_DIM), jnp.float32)
    packed_f32 = pack_params(params, jnp.float32)
    out2 = jax.block_until_ready(fwd(x2, packed_f32))
    ref2 = imlp_hash_reference(x2, params)
    np.testing.assert_allclose(np.asarray(out2), np.asarray(ref2),
                               rtol=2e-2, atol=2e-2)

    print("KERNEL_OK")
</pallas_src>

<mosaic_0001>
module attributes {stable_mosaic.version = 11 : i64} {
  func.func @_imlp_hash_kernel(%arg0: i32, %arg1: memref<2x128xf32, #tpu.memory_space<vmem>>, %arg2: memref<32x16xbf16, #tpu.memory_space<vmem>>, %arg3: memref<6x32x32xbf16, #tpu.memory_space<vmem>>, %arg4: memref<32x16xbf16, #tpu.memory_space<vmem>>, %arg5: memref<3x32xbf16, #tpu.memory_space<vmem>>, %arg6: memref<8x32x1xf32, #tpu.memory_space<vmem>>, %arg7: memref<3x128xf32, #tpu.memory_space<vmem>>, %arg8: memref<16x128xf32, #tpu.memory_space<vmem>>) attributes {dimension_semantics = [#tpu.dimension_semantics<parallel>], iteration_bounds = array<i64: 2>, scalar_prefetch = 0 : i64, scratch_operands = 1 : i64, tpu.core_type = #tpu.core_type<tc>, window_params = [{transform_indices = @transform_0, window_bounds = array<i64: 2, 128>}, {pipeline_mode = #tpu.pipeline_mode<synchronous>, transform_indices = @transform_1, window_bounds = array<i64: 32, 16>}, {pipeline_mode = #tpu.pipeline_mode<synchronous>, transform_indices = @transform_2, window_bounds = array<i64: 6, 32, 32>}, {pipeline_mode = #tpu.pipeline_mode<synchronous>, transform_indices = @transform_3, window_bounds = array<i64: 32, 16>}, {pipeline_mode = #tpu.pipeline_mode<synchronous>, transform_indices = @transform_4, window_bounds = array<i64: 3, 32>}, {pipeline_mode = #tpu.pipeline_mode<synchronous>, transform_indices = @transform_5, window_bounds = array<i64: 8, 32, 1>}, {transform_indices = @transform_6, window_bounds = array<i64: 3, 128>}]} {
    %c0 = arith.constant 0 : index
    %c0_0 = arith.constant 0 : index
    %0 = vector.load %arg1[%c0, %c0_0] : memref<2x128xf32, #tpu.memory_space<vmem>>, vector<2x128xf32>
    %cst = arith.constant 3.14159274 : f32
    %1 = vector.broadcast %cst : f32 to vector<2x128xf32>
    %2 = arith.mulf %0, %1 : vector<2x128xf32>
    %3 = math.sin %2 : vector<2x128xf32>
    %cst_1 = arith.constant 3.14159274 : f32
    %4 = vector.broadcast %cst_1 : f32 to vector<2x128xf32>
    %5 = arith.mulf %0, %4 : vector<2x128xf32>
    %6 = math.cos %5 : vector<2x128xf32>
    %c0_2 = arith.constant 0 : index
    %c0_3 = arith.constant 0 : index
    %7 = vector.load %arg8[%c0_2, %c0_3] : memref<16x128xf32, #tpu.memory_space<vmem>>, vector<2x128xf32>
    tpu.vector_store %arg8[%c0_2, %c0_3], %3 {strides = array<i32>} : memref<16x128xf32, #tpu.memory_space<vmem>>, vector<2x128xf32>,
    %c2 = arith.constant 2 : index
    %c0_4 = arith.constant 0 : index
    %8 = vector.load %arg8[%c2, %c0_4] : memref<16x128xf32, #tpu.memory_space<vmem>>, vector<2x128xf32>
    tpu.vector_store %arg8[%c2, %c0_4], %6 {strides = array<i32>} : memref<16x128xf32, #tpu.memory_space<vmem>>, vector<2x128xf32>,
    %cst_5 = arith.constant 2.000000e+00 : f32
    %9 = vector.broadcast %cst_5 : f32 to vector<2x128xf32>
    %10 = arith.mulf %9, %3 : vector<2x128xf32>
    %11 = arith.mulf %10, %6 : vector<2x128xf32>
    %cst_6 = arith.constant 2.000000e+00 : f32
    %12 = vector.broadcast %cst_6 : f32 to vector<2x128xf32>
    %13 = arith.mulf %12, %3 : vector<2x128xf32>
    %14 = arith.mulf %13, %3 : vector<2x128xf32>
    %cst_7 = arith.constant 1.000000e+00 : f32
    %15 = vector.broadcast %cst_7 : f32 to vector<2x128xf32>
    %16 = arith.subf %15, %14 : vector<2x128xf32>
    %c4 = arith.constant 4 : index
    %c0_8 = arith.constant 0 : index
    %17 = vector.load %arg8[%c4, %c0_8] : memref<16x128xf32, #tpu.memory_space<vmem>>, vector<2x128xf32>
    tpu.vector_store %arg8[%c4, %c0_8], %11 {strides = array<i32>} : memref<16x128xf32, #tpu.memory_space<vmem>>, vector<2x128xf32>,
    %c6 = arith.constant 6 : index
    %c0_9 = arith.constant 0 : index
    %18 = vector.load %arg8[%c6, %c0_9] : memref<16x128xf32, #tpu.memory_space<vmem>>, vector<2x128xf32>
    tpu.vector_store %arg8[%c6, %c0_9], %16 {strides = array<i32>} : memref<16x128xf32, #tpu.memory_space<vmem>>, vector<2x128xf32>,
    %cst_10 = arith.constant 2.000000e+00 : f32
    %19 = vector.broadcast %cst_10 : f32 to vector<2x128xf32>
    %20 = arith.mulf %19, %11 : vector<2x128xf32>
    %21 = arith.mulf %20, %16 : vector<2x128xf32>
    %cst_11 = arith.constant 2.000000e+00 : f32
    %22 = vector.broadcast %cst_11 : f32 to vector<2x128xf32>
    %23 = arith.mulf %22, %11 : vector<2x128xf32>
    %24 = arith.mulf %23, %11 : vector<2x128xf32>
    %cst_12 = arith.constant 1.000000e+00 : f32
    %25 = vector.broadcast %cst_12 : f32 to vector<2x128xf32>
    %26 = arith.subf %25, %24 : vector<2x128xf32>
    %c8 = arith.constant 8 : index
    %c0_13 = arith.constant 0 : index
    %27 = vector.load %arg8[%c8, %c0_13] : memref<16x128xf32, #tpu.memory_space<vmem>>, vector<2x128xf32>
    tpu.vector_store %arg8[%c8, %c0_13], %21 {strides = array<i32>} : memref<16x128xf32, #tpu.memory_space<vmem>>, vector<2x128xf32>,
    %c10 = arith.constant 10 : index
    %c0_14 = arith.constant 0 : index
    %28 = vector.load %arg8[%c10, %c0_14] : memref<16x128xf32, #tpu.memory_space<vmem>>, vector<2x128xf32>
    tpu.vector_store %arg8[%c10, %c0_14], %26 {strides = array<i32>} : memref<16x128xf32, #tpu.memory_space<vmem>>, vector<2x128xf32>,
    %cst_15 = arith.constant 2.000000e+00 : f32
    %29 = vector.broadcast %cst_15 : f32 to vector<2x128xf32>
    %30 = arith.mulf %29, %21 : vector<2x128xf32>
    %31 = arith.mulf %30, %26 : vector<2x128xf32>
    %cst_16 = arith.constant 2.000000e+00 : f32
    %32 = vector.broadcast %cst_16 : f32 to vector<2x128xf32>
    %33 = arith.mulf %32, %21 : vector<2x128xf32>
    %34 = arith.mulf %33, %21 : vector<2x128xf32>
    %cst_17 = arith.constant 1.000000e+00 : f32
    %35 = vector.broadcast %cst_17 : f32 to vector<2x128xf32>
    %36 = arith.subf %35, %34 : vector<2x128xf32>
    %c12 = arith.constant 12 : index
    %c0_18 = arith.constant 0 : index
    %37 = vector.load %arg8[%c12, %c0_18] : memref<16x128xf32, #tpu.memory_space<vmem>>, vector<2x128xf32>
    tpu.vector_store %arg8[%c12, %c0_18], %31 {strides = array<i32>} : memref<16x128xf32, #tpu.memory_space<vmem>>, vector<2x128xf32>,
    %c14 = arith.constant 14 : index
    %c0_19 = arith.constant 0 : index
    %38 = vector.load %arg8[%c14, %c0_19] : memref<16x128xf32, #tpu.memory_space<vmem>>, vector<2x128xf32>
    tpu.vector_store %arg8[%c14, %c0_19], %36 {strides = array<i32>} : memref<16x128xf32, #tpu.memory_space<vmem>>, vector<2x128xf32>,
    %c0_20 = arith.constant 0 : index
    %c0_21 = arith.constant 0 : index
    %39 = vector.load %arg8[%c0_20, %c0_21] : memref<16x128xf32, #tpu.memory_space<vmem>>, vector<16x128xf32>
    %40 = arith.truncf %39 : vector<16x128xf32> to vector<16x128xbf16>
    %c0_22 = arith.constant 0 : index
    %c0_23 = arith.constant 0 : index
    %41 = vector.load %arg2[%c0_22, %c0_23] : memref<32x16xbf16, #tpu.memory_space<vmem>>, vector<32x16xbf16>
    %cst_24 = arith.constant dense<0.000000e+00> : vector<32x128xf32>
    %42 = tpu.matmul %41, %40, %cst_24 {dimension_numbers = #tpu.dot_dimension_numbers<[1], [0], [0], [1], [0, 0, 1, 1], [], []>} : vector<32x16xbf16>, vector<16x128xbf16>, vector<32x128xf32> -> vector<32x128xf32>
    %c0_25 = arith.constant 0 : index
    %c0_26 = arith.constant 0 : index
    %c0_27 = arith.constant 0 : index
    %43 = vector.load %arg6[%c0_25, %c0_26, %c0_27] : memref<8x32x1xf32, #tpu.memory_space<vmem>>, vector<1x32x1xf32>
    %44 = vector.shape_cast %43 : vector<1x32x1xf32> to vector<32x1xf32>
    %45 = vector.broadcast %44 : vector<32x1xf32> to vector<32x128xf32>
    %46 = arith.addf %42, %45 : vector<32x128xf32>
    %cst_28 = arith.constant 0.000000e+00 : f32
    %47 = vector.broadcast %cst_28 : f32 to vector<32x128xf32>
    %48 = arith.maximumf %46, %47 : vector<32x128xf32>
    %c0_29 = arith.constant 0 : index
    %c0_30 = arith.constant 0 : index
    %c0_31 = arith.constant 0 : index
    %49 = vector.load %arg3[%c0_29, %c0_30, %c0_31] : memref<6x32x32xbf16, #tpu.memory_space<vmem>>, vector<1x32x32xbf16>
    %50 = vector.shape_cast %49 : vector<1x32x32xbf16> to vector<32x32xbf16>
    %51 = arith.truncf %48 : vector<32x128xf32> to vector<32x128xbf16>
    %cst_32 = arith.constant dense<0.000000e+00> : vector<32x128xf32>
    %52 = tpu.matmul %50, %51, %cst_32 {dimension_numbers = #tpu.dot_dimension_numbers<[1], [0], [0], [1], [0, 0, 1, 1], [], []>} : vector<32x32xbf16>, vector<32x128xbf16>, vector<32x128xf32> -> vector<32x128xf32>
    %c1 = arith.constant 1 : index
    %c0_33 = arith.constant 0 : index
    %c0_34 = arith.constant 0 : index
    %53 = vector.load %arg6[%c1, %c0_33, %c0_34] : memref<8x32x1xf32, #tpu.memory_space<vmem>>, vector<1x32x1xf32>
    %54 = vector.shape_cast %53 : vector<1x32x1xf32> to vector<32x1xf32>
    %55 = vector.broadcast %54 : vector<32x1xf32> to vector<32x128xf32>
    %56 = arith.addf %52, %55 : vector<32x128xf32>
    %cst_35 = arith.constant 0.000000e+00 : f32
    %57 = vector.broadcast %cst_35 : f32 to vector<32x128xf32>
    %58 = arith.maximumf %56, %57 : vector<32x128xf32>
    %c1_36 = arith.constant 1 : index
    %c0_37 = arith.constant 0 : index
    %c0_38 = arith.constant 0 : index
    %59 = vector.load %arg3[%c1_36, %c0_37, %c0_38] : memref<6x32x32xbf16, #tpu.memory_space<vmem>>, vector<1x32x32xbf16>
    %60 = vector.shape_cast %59 : vector<1x32x32xbf16> to vector<32x32xbf16>
    %61 = arith.truncf %58 : vector<32x128xf32> to vector<32x128xbf16>
    %cst_39 = arith.constant dense<0.000000e+00> : vector<32x128xf32>
    %62 = tpu.matmul %60, %61, %cst_39 {dimension_numbers = #tpu.dot_dimension_numbers<[1], [0], [0], [1], [0, 0, 1, 1], [], []>} : vector<32x32xbf16>, vector<32x128xbf16>, vector<32x128xf32> -> vector<32x128xf32>
    %c2_40 = arith.constant 2 : index
    %c0_41 = arith.constant 0 : index
    %c0_42 = arith.constant 0 : index
    %63 = vector.load %arg6[%c2_40, %c0_41, %c0_42] : memref<8x32x1xf32, #tpu.memory_space<vmem>>, vector<1x32x1xf32>
    %64 = vector.shape_cast %63 : vector<1x32x1xf32> to vector<32x1xf32>
    %65 = vector.broadcast %64 : vector<32x1xf32> to vector<32x128xf32>
    %66 = arith.addf %62, %65 : vector<32x128xf32>
    %cst_43 = arith.constant 0.000000e+00 : f32
    %67 = vector.broadcast %cst_43 : f32 to vector<32x128xf32>
    %68 = arith.maximumf %66, %67 : vector<32x128xf32>
    %c2_44 = arith.constant 2 : index
    %c0_45 = arith.constant 0 : index
    %c0_46 = arith.constant 0 : index
    %69 = vector.load %arg3[%c2_44, %c0_45, %c0_46] : memref<6x32x32xbf16, #tpu.memory_space<vmem>>, vector<1x32x32xbf16>
    %70 = vector.shape_cast %69 : vector<1x32x32xbf16> to vector<32x32xbf16>
    %71 = arith.truncf %68 : vector<32x128xf32> to vector<32x128xbf16>
    %cst_47 = arith.constant dense<0.000000e+00> : vector<32x128xf32>
    %72 = tpu.matmul %70, %71, %cst_47 {dimension_numbers = #tpu.dot_dimension_numbers<[1], [0], [0], [1], [0, 0, 1, 1], [], []>} : vector<32x32xbf16>, vector<32x128xbf16>, vector<32x128xf32> -> vector<32x128xf32>
    %c3 = arith.constant 3 : index
    %c0_48 = arith.constant 0 : index
    %c0_49 = arith.constant 0 : index
    %73 = vector.load %arg6[%c3, %c0_48, %c0_49] : memref<8x32x1xf32, #tpu.memory_space<vmem>>, vector<1x32x1xf32>
    %74 = vector.shape_cast %73 : vector<1x32x1xf32> to vector<32x1xf32>
    %75 = vector.broadcast %74 : vector<32x1xf32> to vector<32x128xf32>
    %76 = arith.addf %72, %75 : vector<32x128xf32>
    %cst_50 = arith.constant 0.000000e+00 : f32
    %77 = vector.broadcast %cst_50 : f32 to vector<32x128xf32>
    %78 = arith.maximumf %76, %77 : vector<32x128xf32>
    %c3_51 = arith.constant 3 : index
    %c0_52 = arith.constant 0 : index
    %c0_53 = arith.constant 0 : index
    %79 = vector.load %arg3[%c3_51, %c0_52, %c0_53] : memref<6x32x32xbf16, #tpu.memory_space<vmem>>, vector<1x32x32xbf16>
    %80 = vector.shape_cast %79 : vector<1x32x32xbf16> to vector<32x32xbf16>
    %81 = arith.truncf %78 : vector<32x128xf32> to vector<32x128xbf16>
    %cst_54 = arith.constant dense<0.000000e+00> : vector<32x128xf32>
    %82 = tpu.matmul %80, %81, %cst_54 {dimension_numbers = #tpu.dot_dimension_numbers<[1], [0], [0], [1], [0, 0, 1, 1], [], []>} : vector<32x32xbf16>, vector<32x128xbf16>, vector<32x128xf32> -> vector<32x128xf32>
    %c0_55 = arith.constant 0 : index
    %c0_56 = arith.constant 0 : index
    %83 = vector.load %arg4[%c0_55, %c0_56] : memref<32x16xbf16, #tpu.memory_space<vmem>>, vector<32x16xbf16>
    %cst_57 = arith.constant dense<0.000000e+00> : vector<32x128xf32>
    %84 = tpu.matmul %83, %40, %cst_57 {dimension_numbers = #tpu.dot_dimension_numbers<[1], [0], [0], [1], [0, 0, 1, 1], [], []>} : vector<32x16xbf16>, vector<16x128xbf16>, vector<32x128xf32> -> vector<32x128xf32>
    %85 = arith.addf %82, %84 : vector<32x128xf32>
    %c4_58 = arith.constant 4 : index
    %c0_59 = arith.constant 0 : index
    %c0_60 = arith.constant 0 : index
    %86 = vector.load %arg6[%c4_58, %c0_59, %c0_60] : memref<8x32x1xf32, #tpu.memory_space<vmem>>, vector<1x32x1xf32>
    %87 = vector.shape_cast %86 : vector<1x32x1xf32> to vector<32x1xf32>
    %88 = vector.broadcast %87 : vector<32x1xf32> to vector<32x128xf32>
    %89 = arith.addf %85, %88 : vector<32x128xf32>
    %cst_61 = arith.constant 0.000000e+00 : f32
    %90 = vector.broadcast %cst_61 : f32 to vector<32x128xf32>
    %91 = arith.maximumf %89, %90 : vector<32x128xf32>
    %c4_62 = arith.constant 4 : index
    %c0_63 = arith.constant 0 : index
    %c0_64 = arith.constant 0 : index
    %92 = vector.load %arg3[%c4_62, %c0_63, %c0_64] : memref<6x32x32xbf16, #tpu.memory_space<vmem>>, vector<1x32x32xbf16>
    %93 = vector.shape_cast %92 : vector<1x32x32xbf16> to vector<32x32xbf16>
    %94 = arith.truncf %91 : vector<32x128xf32> to vector<32x128xbf16>
    %cst_65 = arith.constant dense<0.000000e+00> : vector<32x128xf32>
    %95 = tpu.matmul %93, %94, %cst_65 {dimension_numbers = #tpu.dot_dimension_numbers<[1], [0], [0], [1], [0, 0, 1, 1], [], []>} : vector<32x32xbf16>, vector<32x128xbf16>, vector<32x128xf32> -> vector<32x128xf32>
    %c5 = arith.constant 5 : index
    %c0_66 = arith.constant 0 : index
    %c0_67 = arith.constant 0 : index
    %96 = vector.load %arg6[%c5, %c0_66, %c0_67] : memref<8x32x1xf32, #tpu.memory_space<vmem>>, vector<1x32x1xf32>
    %97 = vector.shape_cast %96 : vector<1x32x1xf32> to vector<32x1xf32>
    %98 = vector.broadcast %97 : vector<32x1xf32> to vector<32x128xf32>
    %99 = arith.addf %95, %98 : vector<32x128xf32>
    %cst_68 = arith.constant 0.000000e+00 : f32
    %100 = vector.broadcast %cst_68 : f32 to vector<32x128xf32>
    %101 = arith.maximumf %99, %100 : vector<32x128xf32>
    %c5_69 = arith.constant 5 : index
    %c0_70 = arith.constant 0 : index
    %c0_71 = arith.constant 0 : index
    %102 = vector.load %arg3[%c5_69, %c0_70, %c0_71] : memref<6x32x32xbf16, #tpu.memory_space<vmem>>, vector<1x32x32xbf16>
    %103 = vector.shape_cast %102 : vector<1x32x32xbf16> to vector<32x32xbf16>
    %104 = arith.truncf %101 : vector<32x128xf32> to vector<32x128xbf16>
    %cst_72 = arith.constant dense<0.000000e+00> : vector<32x128xf32>
    %105 = tpu.matmul %103, %104, %cst_72 {dimension_numbers = #tpu.dot_dimension_numbers<[1], [0], [0], [1], [0, 0, 1, 1], [], []>} : vector<32x32xbf16>, vector<32x128xbf16>, vector<32x128xf32> -> vector<32x128xf32>
    %c6_73 = arith.constant 6 : index
    %c0_74 = arith.constant 0 : index
    %c0_75 = arith.constant 0 : index
    %106 = vector.load %arg6[%c6_73, %c0_74, %c0_75] : memref<8x32x1xf32, #tpu.memory_space<vmem>>, vector<1x32x1xf32>
    %107 = vector.shape_cast %106 : vector<1x32x1xf32> to vector<32x1xf32>
    %108 = vector.broadcast %107 : vector<32x1xf32> to vector<32x128xf32>
    %109 = arith.addf %105, %108 : vector<32x128xf32>
    %cst_76 = arith.constant 0.000000e+00 : f32
    %110 = vector.broadcast %cst_76 : f32 to vector<32x128xf32>
    %111 = arith.maximumf %109, %110 : vector<32x128xf32>
    %c0_77 = arith.constant 0 : index
    %c0_78 = arith.constant 0 : index
    %112 = vector.load %arg5[%c0_77, %c0_78] : memref<3x32xbf16, #tpu.memory_space<vmem>>, vector<3x32xbf16>
    %113 = arith.truncf %111 : vector<32x128xf32> to vector<32x128xbf16>
    %cst_79 = arith.constant dense<0.000000e+00> : vector<3x128xf32>
    %114 = tpu.matmul %112, %113, %cst_79 {dimension_numbers = #tpu.dot_dimension_numbers<[1], [0], [0], [1], [0, 0, 1, 1], [], []>} : vector<3x32xbf16>, vector<32x128xbf16>, vector<3x128xf32> -> vector<3x128xf32>
    %c7 = arith.constant 7 : index
    %c0_80 = arith.constant 0 : index
    %c0_81 = arith.constant 0 : index
    %115 = vector.load %arg6[%c7, %c0_80, %c0_81] : memref<8x32x1xf32, #tpu.memory_space<vmem>>, vector<1x3x1xf32>
    %116 = vector.shape_cast %115 : vector<1x3x1xf32> to vector<3x1xf32>
    %117 = vector.broadcast %116 : vector<3x1xf32> to vector<3x128xf32>
    %118 = arith.addf %114, %117 : vector<3x128xf32>
    %119 = math.tanh %118 : vector<3x128xf32>
    %c0_82 = arith.constant 0 : index
    %c0_83 = arith.constant 0 : index
    %120 = vector.load %arg7[%c0_82, %c0_83] : memref<3x128xf32, #tpu.memory_space<vmem>>, vector<3x128xf32>
    tpu.vector_store %arg7[%c0_82, %c0_83], %119 {strides = array<i32>} : memref<3x128xf32, #tpu.memory_space<vmem>>, vector<3x128xf32>,
    return
  }
  func.func @transform_0(%arg0: i32) -> (i32, i32) {
    %c0_i32 = arith.constant 0 : i32
    %c0_i32_0 = arith.constant 0 : i32
    return %c0_i32, %arg0 : i32, i32
  }
  func.func @transform_1(%arg0: i32) -> (i32, i32) {
    %c0_i32 = arith.constant 0 : i32
    %c0_i32_0 = arith.constant 0 : i32
    %c0_i32_1 = arith.constant 0 : i32
    return %c0_i32, %c0_i32_0 : i32, i32
  }
  func.func @transform_2(%arg0: i32) -> (i32, i32, i32) {
    %c0_i32 = arith.constant 0 : i32
    %c0_i32_0 = arith.constant 0 : i32
    %c0_i32_1 = arith.constant 0 : i32
    %c0_i32_2 = arith.constant 0 : i32
    return %c0_i32, %c0_i32_0, %c0_i32_1 : i32, i32, i32
  }
  func.func @transform_3(%arg0: i32) -> (i32, i32) {
    %c0_i32 = arith.constant 0 : i32
    %c0_i32_0 = arith.constant 0 : i32
    %c0_i32_1 = arith.constant 0 : i32
    return %c0_i32, %c0_i32_0 : i32, i32
  }
  func.func @transform_4(%arg0: i32) -> (i32, i32) {
    %c0_i32 = arith.constant 0 : i32
    %c0_i32_0 = arith.constant 0 : i32
    %c0_i32_1 = arith.constant 0 : i32
    return %c0_i32, %c0_i32_0 : i32, i32
  }
  func.func @transform_5(%arg0: i32) -> (i32, i32, i32) {
    %c0_i32 = arith.constant 0 : i32
    %c0_i32_0 = arith.constant 0 : i32
    %c0_i32_1 = arith.constant 0 : i32
    %c0_i32_2 = arith.constant 0 : i32
    return %c0_i32, %c0_i32_0, %c0_i32_1 : i32, i32, i32
  }
  func.func @transform_6(%arg0: i32) -> (i32, i32) {
    %c0_i32 = arith.constant 0 : i32
    %c0_i32_0 = arith.constant 0 : i32
    return %c0_i32, %arg0 : i32, i32
  }
}

</mosaic_0001>

<bundles_post_ra>
// kernel: imlp_hash_forward.1
= control target key start
LH: loop header
LB: loop body
LE: loop exit
PB: predicated region body
PF: predicated region fallthrough
CT: control target
= control target key end

     0   :  { %s1662_s21 = smov 0   ;;  %s1876_s0 = inlined_call_operand.vmem [shape: f32[2,256], index: 0, kind: input, shape index: {}]   ;;  %s1877_s1 = inlined_call_operand.vmem [shape: bf16[32,16], index: 1, kind: input, shape index: {}]   ;;  %s1878_s2 = inlined_call_operand.vmem [shape: bf16[6,32,32], index: 2, kind: input, shape index: {}]   ;;  %s1879_s3 = inlined_call_operand.vmem [shape: bf16[32,16], index: 3, kind: input, shape index: {}]   ;;  %s1880_s4 = inlined_call_operand.vmem [shape: bf16[3,32], index: 4, kind: input, shape index: {}]   ;;  %s1881_s5 = inlined_call_operand.vmem [shape: f32[8,32,1], index: 5, kind: input, shape index: {}]   ;;  %s1882_s6 = inlined_call_operand.vmem [shape: f32[3,256], index: 6, kind: output, shape index: {}]  }
   0x1 LB: > { %s1365_s22 = sadd.s32 4294967295, %s1616_s21   ;;  %p1369_p0 = scmp.ge.s32.totalorder %s1616_s21, 1  ;;  %s1616_s21 = sphi %s1662_s21, %s16_s21  }
   0x2   : > { %p211_p1 = scmp.lt.s32.totalorder %s1616_s21, 3 }
   0x4   : > { %p212_p2 = pnand %p1369_p0, %p211_p1 }
   0x5   : > { %p239_p3 = scmp.lt.s32.totalorder (!%p212_p2), %s1365_s22, 1  ;;  %v1588_v0 = vld [vmem:[%s1877_s1] sm:$0xff] (!%p212_p2)   ;;  %vm518_vm0 = vcmask (!%p212_p2), 130048   ;;  %v1618_v2 = vmov (!%p212_p2), 0   ;;  %v486_v3 = vld [vmem:[%s1881_s5 + $0x10] sm:$0xff] (!%p212_p2)  ;;  %v485_v6 = vld [vmem:[%s1881_s5 + $0x8] sm:$0xff] (!%p212_p2) }
   0x6   : > { %215 = sbr.rel (%p212_p2) target bundleno = 1955 (0x7a3), region = 44  ;;  %1495 = vmatprep.mubr.msk.bf16.mxu0 (!%p212_p2), %vm518_vm0, %v1588_v0  ;;  %v484_v1 = vld [vmem:[%s1881_s5] sm:$0xff] (!%p212_p2)  ;;  %1586 = vset.pattern.permute.xlu0 (!%p212_p2), %v1618_v2  ;;  %v487_v7 = vld [vmem:[%s1881_s5 + $0x18] sm:$0xff] (!%p212_p2)  ;;  %v1385_v13 = vld [vmem:[%s1881_s5 + $0x28] sm:$0xff] (!%p212_p2)  ;;  %v1619_v26 = vmov (!%p212_p2), 683565275  }
   0x7   : > { %1587 = vset.pattern.permute.xlu1 (!%p212_p2), %v1618_v2  ;;  %490 = vperm.xlu0 (!%p212_p2), %1586, %v484_v1   ;;  %v1384_v12 = vld [vmem:[%s1881_s5 + $0x20] sm:$0xff] (!%p212_p2)  ;;  %v1386_v17 = vld [vmem:[%s1881_s5 + $0x30] sm:$0xff] (!%p212_p2)  ;;  %v1387_v18 = vld [vmem:[%s1881_s5 + $0x38] sm:$0xff] (!%p212_p2)  ;;  %v1620_v28 = vmov (!%p212_p2), 2475754826  }
   0x8   : > { %500 = vperm.xlu1 (!%p212_p2), %1587, %v486_v3   ;;  %v1396_v19 = vld [vmem:[%s1881_s5 + $0x40] sm:$0xff] (!%p212_p2)  ;;  %v1397_v20 = vld [vmem:[%s1881_s5 + $0x48] sm:$0xff] (!%p212_p2)  ;;  %v1621_v30 = vmov (!%p212_p2), 2131351028   ;;  %v1398_v32 = vld [vmem:[%s1881_s5 + $0x50] sm:$0xff] (!%p212_p2) }
   0x9   : > { %v1399_v33 = vld [vmem:[%s1881_s5 + $0x58] sm:$0xff] (!%p212_p2)  ;;  %v1622_v34 = vmov (!%p212_p2), 2102212464   ;;  %v1623_v36 = vmov (!%p212_p2), 920167782   ;;  %v1408_v54 = vld [vmem:[%s1881_s5 + $0x60] sm:$0xff] (!%p212_p2) }
   0xa   : > { %v1624_v43 = vmov (!%p212_p2), 1326507024   ;;  %v1409_v55 = vld [vmem:[%s1881_s5 + $0x68] sm:$0xff] (!%p212_p2) }
   0xb   : > { %495 = vperm.xlu0 (!%p212_p2), %1586, %v485_v6   ;;  %v1411_v6 = vld [vmem:[%s1881_s5 + $0x78] sm:$0xff] (!%p212_p2) }
   0xc   : > { %505 = vperm.xlu1 (!%p212_p2), %1587, %v487_v7  }
   0xd   : > { %s1884_s22 = smov (!%p239_p3, %s1365_s22), 1 }
   0xe   : > { %s1370_s25 = sshll.u32 %s1884_s22, 1  ;;  %s1371_s7 = sshll.u32 %s1884_s22, 2 }
   0xf   : > { %s242_s30 = scalar_lea.vmem %s1876_s0, %s1370_s25  ;;  %591 = vperm.xlu0 %1586, %v1384_v12   ;;  %s246_s10 = scalar_lea.vmem %s1882_s6, %s1371_s7 }
  0x10   : > { %v248_v4 = vld [vmem:[%s242_s30] sm:$0x3]  ;;  %596 = vperm.xlu1 %1587, %v1385_v13  }
  0x11   : > { %v1686_v5 = vmul.f32 3.1415927, %v248_v4  ;;  %v1410_v4 = vld [vmem:[%s1881_s5 + $0x70] sm:$0xff] }
  0x13   : > { %v250_v8 = vand.u32 2147483647, %v1686_v5  ;;  %v253_v9 = vand.u32 2139095040, %v1686_v5  ;;  %601 = vperm.xlu0 %1586, %v1386_v17   ;;  %vm252_vm8 = vcmp.lt.s32.totalorder %v1686_v5, 0 }
  0x14   : > { %606 = vperm.xlu1 %1587, %v1387_v18   ;;  %v1436_v18 = vld [vmem:[%s1881_s5 + $0xa0] sm:$0xff] }
  0x15   : > { %v254_v10 = vshrl.u32 %v253_v9, 23  ;;  %v257_v11 = vand.u32 8388607, %v250_v8  ;;  %vm251_vm9 = vcmp.le.f32.partialorder %v250_v8, 0.7853982 }
  0x17   : > { %v1372_v14 = vadd.s32 4294967169, %v254_v10  ;;  %v258_v15 = vor.u32 8388608, %v257_v11  ;;  %693 = vperm.xlu0 %1586, %v1396_v19   ;;  %v1428_v10 = vld [vmem:[%s1881_s5 + $0x80] sm:$0xff]  ;;  %v1429_v11 = vld [vmem:[%s1881_s5 + $0x88] sm:$0xff] }
  0x18   : > { %698 = vperm.xlu1 %1587, %v1397_v20   ;;  %v1437_v19 = vld [vmem:[%s1881_s5 + $0xa8] sm:$0xff] }
  0x19   : > { %v260_v16 = vadd.s32 1, %v1372_v14  ;;  %v1716_v22 = vshll.u32 %v258_v15, 8  ;;  %v1430_v14 = vld [vmem:[%s1881_s5 + $0x90] sm:$0xff]  ;;  %v1431_v15 = vld [vmem:[%s1881_s5 + $0x98] sm:$0xff] }
  0x1b   : > { %vm261_vm1 = vcmp.gt.s32.totalorder %v260_v16, 0  ;;  %703 = vperm.xlu0 %1586, %v1398_v32  }
  0x1c   : > { %v262_v21 = vsel %vm261_vm1, %v260_v16, 0  ;;  %708 = vperm.xlu1 %1587, %v1399_v33   ;;  %vm342_vm1 = vweird.f32 %v1686_v5 }
  0x1d   : > { %v263_v23 = vshrl.u32 %v262_v21, 5  ;;  %v264_v24 = vand.u32 31, %v262_v21 }
  0x1f   : > { %v265_v25 = vsub.s32 32, %v264_v24  ;;  %v267_v27 = vshll.u32 %v1619_v26, %v264_v24  ;;  %v270_v29 = vshll.u32 %v1620_v28, %v264_v24  ;;  %v273_v31 = vshll.u32 %v1621_v30, %v264_v24  ;;  %794 = vperm.xlu0 %1586, %v1408_v54  }
  0x20   : > { %v276_v35 = vshll.u32 %v1622_v34, %v264_v24  ;;  %v279_v37 = vshll.u32 %v1623_v36, %v264_v24  ;;  %vm282_vm2 = vcmp.lt.s32.totalorder %v263_v23, 1  ;;  %vm283_vm3 = vcmp.lt.s32.totalorder %v263_v23, 2  ;;  %799 = vperm.xlu1 %1587, %v1409_v55  }
  0x21   : > { %v266_v38 = vshrl.u32 %v1619_v26, %v265_v25  ;;  %v268_v39 = vshrl.u32 %v1620_v28, %v265_v25  ;;  %v271_v40 = vshrl.u32 %v1621_v30, %v265_v25  ;;  %v274_v41 = vshrl.u32 %v1622_v34, %v265_v25  ;;  %v1448_v26 = vld [vmem:[%s1881_s5 + $0xc0] sm:$0xff]  ;;  %v1450_v30 = vld [vmem:[%s1881_s5 + $0xd0] sm:$0xff] }
  0x22   : > { %v277_v42 = vshrl.u32 %v1623_v36, %v265_v25  ;;  %v280_v44 = vshrl.u32 %v1624_v43, %v265_v25  ;;  %vm284_vm4 = vcmp.lt.s32.totalorder %v263_v23, 3  ;;  %vm285_vm5 = vcmp.lt.s32.totalorder %v263_v23, 4  ;;  %v1439_v23 = vld [vmem:[%s1881_s5 + $0xb8] sm:$0xff] }
  0x23   : > { %v269_v45 = vor.u32 %v268_v39, %v267_v27  ;;  %v272_v46 = vor.u32 %v271_v40, %v270_v29  ;;  %v275_v47 = vor.u32 %v274_v41, %v273_v31  ;;  %804 = vperm.xlu0 %1586, %v1410_v4   ;;  %v1449_v27 = vld [vmem:[%s1881_s5 + $0xc8] sm:$0xff]  ;;  %v1451_v31 = vld [vmem:[%s1881_s5 + $0xd8] sm:$0xff] }
  0x24   : > { %v278_v48 = vor.u32 %v277_v42, %v276_v35  ;;  %v281_v49 = vor.u32 %v280_v44, %v279_v37  ;;  %809 = vperm.xlu1 %1587, %v1411_v6   ;;  %v1456_v37 = vld [vmem:[%s1881_s5 + $0xe0] sm:$0x7] }
  0x25   : > { %v286_v50 = vsel %vm282_vm2, %v266_v38, %v269_v45  ;;  %v287_v51 = vsel %vm285_vm5, %v275_v47, 2102212464  ;;  %v290_v52 = vsel %vm282_vm2, %v269_v45, %v272_v46  ;;  %v294_v53 = vsel %vm282_vm2, %v272_v46, %v275_v47 }
  0x26   : > { %v288_v56 = vsel %vm284_vm4, %v272_v46, %v287_v51  ;;  %v291_v57 = vsel %vm285_vm5, %v278_v48, 920167782  ;;  %v295_v58 = vsel %vm285_vm5, %v281_v49, 1326507024  ;;  %vm619_vm2 = vcmask 261120  }
  0x27   : > { %v292_v59 = vsel %vm284_vm4, %v275_v47, %v291_v57  ;;  %v296_v60 = vsel %vm284_vm4, %v278_v48, %v295_v58  ;;  %v289_v61 = vsel %vm283_vm3, %v286_v50, %v288_v56  ;;  %1029 = vperm.xlu0 %1586, %v1428_v10  }
  0x28   : > { %v293_v62 = vsel %vm283_vm3, %v290_v52, %v292_v59  ;;  %v297_v63 = vsel %vm283_vm3, %v294_v53, %v296_v60  ;;  %v305_v7 = vmul.u32 %v1716_v22, %v289_v61  ;;  %1034 = vperm.xlu1 %1587, %v1429_v11  }
  0x29   : > { %v1743_v0 = vmul.u32.u64.low %v1716_v22, %v297_v63  ;;  %v1744_v1 = vmul.u32.u64.high %v1716_v22, %v297_v63, %v1743_v0  ;;  %v1747_v2 = vmul.u32.u64.low %v1716_v22, %v293_v62  ;;  %v1748_v3 = vmul.u32.u64.high %v1716_v22, %v293_v62, %v1747_v2  ;;  %v1438_v22 = vld [vmem:[%s1881_s5 + $0xb0] sm:$0xff] }
  0x2b   : > { %vm307_vm6 = vc.u32 %v1744_v1, %v1747_v2  ;;  %v308_v9 = vadd.s32 1, %v1748_v3  ;;  %1039 = vperm.xlu0 %1586, %v1430_v14   ;;  %v306_v32 = vadd.s32 %v1747_v2, %v1744_v1 }
  0x2c   : > { %1044 = vperm.xlu1 %1587, %v1431_v15  }
  0x2d   : > { %v309_v12 = vsel %vm307_vm6, %v308_v9, %v1748_v3 }
  0x2e   : > { %v310_v13 = vadd.s32 %v309_v12, %v305_v7 }
  0x2f   : > { %1069 = vperm.xlu0 %1586, %v1436_v18   ;;  %v1589_v18 = vld [vmem:[%s1877_s1 + $0x8] sm:$0xff]  }
  0x30   : > { %v311_v16 = vadd.s32 536870912, %v310_v13  ;;  %1074 = vperm.xlu1 %1587, %v1437_v19   ;;  %v1590_v19 = vld [vmem:[%s1878_s2] sm:$0xff]  }
  0x31   : > { %1503 = vmatprep.mubr.msk.bf16.mxu1 %vm619_vm2, %v1590_v19 }
  0x32   : > { %v312_v17 = vshrl.u32 %v311_v16, 30 }
  0x33   : > { %1079 = vperm.xlu0 %1586, %v1438_v22  }
  0x34   : > { %v313_v20 = vshll.u32 %v312_v17, 30  ;;  %1084 = vperm.xlu1 %1587, %v1439_v23   ;;  %v336_v45 = vsub.s32 4, %v312_v17 }
  0x36   : > { %v314_v21 = vsub.s32 %v310_v13, %v313_v20  ;;  %v337_v48 = vsel %vm252_vm8, %v336_v45, %v312_v17 }
  0x37   : > { %1170 = vperm.xlu0 %1586, %v1448_v26   ;;  %v339_v51 = vsel %vm251_vm9, 0, %v337_v48 }
  0x38   : > { %v316_v24 = vsub.s32 0, %v314_v21  ;;  %1175 = vperm.xlu1 %1587, %v1449_v27   ;;  %v343_v52 = vadd.s32 3, %v339_v51  ;;  %v447_v54 = vand.u32 3, %v339_v51 }
  0x3a   : > { %v1373_v25 = vmin.u32 %v316_v24, %v314_v21  ;;  %v344_v53 = vand.u32 3, %v343_v52  ;;  %vm452_vm11 = vcmp.eq.s32.totalorder %v447_v54, 2  ;;  %vm449_vm13 = vcmp.eq.s32.totalorder %v447_v54, 0 }
  0x3b   : > { %1180 = vperm.xlu0 %1586, %v1450_v30   ;;  %vm448_vm15 = vcmp.lt.s32.totalorder %v447_v54, 2 }
  0x3c   : > { %v318_v28 = vclz %v1373_v25  ;;  %1185 = vperm.xlu1 %1587, %v1451_v31   ;;  %vm349_vm10 = vcmp.eq.s32.totalorder %v344_v53, 2  ;;  %vm346_vm12 = vcmp.eq.s32.totalorder %v344_v53, 0  ;;  %vm345_vm14 = vcmp.lt.s32.totalorder %v344_v53, 2 }
  0x3e   : > { %v1374_v29 = vadd.s32 4294967294, %v318_v28 }
  0x3f   : > { %1264 = vperm.xlu0 %1586, %v1456_v37  }
  0x40   : > { %vm1375_vm7 = vcmp.lt.s32.totalorder %v1374_v29, 0 }
  0x41   : > { %v321_v33 = vsel %vm1375_vm7, 0, %v1374_v29 }
  0x42   : > { %v322_v34 = vsub.s32 32, %v321_v33  ;;  %v323_v35 = vshll.u32 %v314_v21, %v321_v33  ;;  %v326_v36 = vsub.s32 4294967266, %v321_v33 }
  0x44   : > { %v324_v38 = vshrl.u32 %v306_v32, %v322_v34  ;;  %v327_v39 = vadd.s32 127, %v326_v36 }
  0x46   : > { %v325_v40 = vor.u32 %v324_v38, %v323_v35  ;;  %v328_v41 = vshll.u32 %v327_v39, 23  ;;  %v1591_v38 = vld [vmem:[%s1878_s2 + $0x8] sm:$0xff]   ;;  %v1592_v39 = vld [vmem:[%s1878_s2 + $0x10] sm:$0xff]  }
  0x48   : > { %v329_v42 = vor.u32 4788187, %v328_v41  ;;  %v332_v43 = vcvt.s32.f32 %v325_v40 }
  0x4a   : > { %v330_v44 = vand.u32 2147483647, %v329_v42 }
  0x4c   : > { %v333_v46 = vmul.f32 %v332_v43, %v330_v44 }
  0x4e   : > { %v334_v47 = vxor.u32 2147483648, %v333_v46 }
  0x50   : > { %v335_v49 = vsel %vm252_vm8, %v334_v47, %v333_v46 }
  0x51   : > { %v338_v50 = vsel %vm251_vm9, %v1686_v5, %v335_v49 }
  0x52   : > { %1604 = vcosq.f32 %v338_v50 }
  0x53   : > { %1606 = vsinq.f32 %v338_v50 }
  0x5c   : > { %v1605_v55 = vpop.eup %1604 }
  0x5d   : > { %v1607_v56 = vpop.eup %1606  ;;  %v350_v57 = vxor.u32 2147483648, %v1605_v55 }
  0x5e   : > { %v347_v8 = vxor.u32 2147483648, %v1607_v56 }
  0x5f   : > { %v351_v58 = vsel %vm349_vm10, %v350_v57, %v1607_v56  ;;  %v454_v59 = vsel %vm452_vm11, %v350_v57, %v1607_v56 }
  0x60   : > { %v348_v60 = vsel %vm346_vm12, %v1605_v55, %v347_v8  ;;  %v451_v61 = vsel %vm449_vm13, %v1605_v55, %v347_v8  ;;  %v1593_v8 = vld [vmem:[%s1878_s2 + $0x18] sm:$0xff]  }
  0x61   : > { %v352_v62 = vsel %vm345_vm14, %v348_v60, %v351_v58  ;;  %v455_v63 = vsel %vm448_vm15, %v451_v61, %v454_v59  ;;  %v1594_v58 = vld [vmem:[%s1878_s2 + $0x20] sm:$0xff]  }
  0x62   : > { %v353_v0 = vsel %vm342_vm1, nan, %v352_v62  ;;  %v456_v1 = vsel %vm342_vm1, nan, %v455_v63 }
  0x63   : > { %457 = vst [vmem:[#allocation2] sm:$0x3] %v353_v0  ;;  %458 = vst [vmem:[#allocation2 + $0x2] sm:$0x3] %v456_v1  ;;  %v459_v2 = vmul.f32 2.0, %v353_v0 }
  0x65   : > { %v460_v3 = vmul.f32 %v459_v2, %v456_v1  ;;  %v461_v4 = vmul.f32 %v459_v2, %v353_v0 }
  0x67   : > { %v462_v6 = vsub.f32 1.0, %v461_v4  ;;  %463 = vst [vmem:[#allocation2 + $0x4] sm:$0x3] %v460_v3  ;;  %v465_v7 = vmul.f32 2.0, %v460_v3 }
  0x69   : > { %464 = vst [vmem:[#allocation2 + $0x6] sm:$0x3] %v462_v6  ;;  %v466_v9 = vmul.f32 %v465_v7, %v462_v6  ;;  %v467_v10 = vmul.f32 %v465_v7, %v460_v3 }
  0x6b   : > { %v468_v5 = vsub.f32 1.0, %v467_v10  ;;  %469 = vst [vmem:[#allocation2 + $0x8] sm:$0x3] %v466_v9  ;;  %v471_v11 = vmul.f32 2.0, %v466_v9 }
  0x6d   : > { %470 = vst [vmem:[#allocation2 + $0xa] sm:$0x3] %v468_v5  ;;  %v472_v12 = vmul.f32 %v471_v11, %v468_v5  ;;  %v473_v13 = vmul.f32 %v471_v11, %v466_v9 }
  0x6f   : > { %v474_v14 = vsub.f32 1.0, %v473_v13  ;;  %475 = vst [vmem:[#allocation2 + $0xc] sm:$0x3] %v472_v12 }
  0x70   : > { %v477_v15 = vld [vmem:[#allocation2] sm:$0xff] }
  0x71   : > { %476 = vst [vmem:[#allocation2 + $0xe] sm:$0x3] %v474_v14  ;;  %v1595_v14 = vld [vmem:[%s1878_s2 + $0x28] sm:$0xff]  }
  0x78   : > { %v478_v16 = vld [vmem:[#allocation2 + $0x8] sm:$0xff] }
  0x79   : > { %v479_v17 = vpack.c.bf16 %v478_v16, %v477_v15  ;;  %v1596_v15 = vld [vmem:[%s1879_s3] sm:$0xff]   ;;  %v1597_v16 = vld [vmem:[%s1879_s3 + $0x8] sm:$0xff]  }
  0x7b   : > { %1493 = vmatprep.subr.bf16.mxu0 %v479_v17 }
  0x7c   : > { %1494 = vmatpush3.bf16.msra.mxu0 %v479_v17 }
  0x7f   : > { %1496 = vmatmul.mubr.msk.bf16.vlgmr.msra.gmra.mrb[0].mxu0 %vm518_vm0, %v1589_v18 }
  0x80   : > { %1511 = vmatprep.mubr.msk.bf16.mxu0 %vm619_vm2, %v1592_v39 }
  0x86   : > { %v491_v21 = vpop.permute.xlu0 %490 }
  0x87   : > { %v501_v20 = vpop.permute.xlu1 %500 }
  0x8a   : > { %v496_v28 = vpop.permute.xlu0 %495 }
  0x8b   : > { %v506_v25 = vpop.permute.xlu1 %505 }
  0x8e   : > { %v592_v40 = vpop.permute.xlu0 %591 }
  0x8f   : > { %v597_v41 = vpop.permute.xlu1 %596 }
  0x92   : > { %v602_v42 = vpop.permute.xlu0 %601 }
  0x93   : > { %v607_v46 = vpop.permute.xlu1 %606 }
  0x96   : > { %v694_v59 = vpop.permute.xlu0 %693 }
  0x97   : > { %v699_v60 = vpop.permute.xlu1 %698 }
  0x9a   : > { %v704_v61 = vpop.permute.xlu0 %703 }
  0x9b   : > { %v709_v1 = vpop.permute.xlu1 %708 }
  0x9e   : > { %v795_v18 = vpop.permute.xlu0 %794 }
  0x9f   : > { %v800_v19 = vpop.permute.xlu1 %799 }
 0x152   : > { %v1497_v22 = vpop.f32.mrb[0].mxu0 }
 0x153   : > { %v568_v23 = vadd.f32 %v1497_v22, %v501_v20  ;;  %v559_v24 = vpop.f32.mrb[1].mxu0  ;;  %v805_v20 = vpop.permute.xlu0 %804 }
 0x154   : > { %v560_v26 = vadd.f32 %v559_v24, %v491_v21  ;;  %v1498_v27 = vpop.f32.mrb[2].mxu0  ;;  %v810_v24 = vpop.permute.xlu1 %809 }
 0x155   : > { %v571_v29 = vadd.f32 %v1498_v27, %v506_v25  ;;  %v562_v30 = vpop.f32.mrb[3].mxu0  ;;  %v576_v32 = vmax.f32 %v568_v23, 0.0 }
 0x156   : > { %v563_v31 = vadd.f32 %v562_v30, %v496_v28  ;;  %v574_v34 = vmax.f32 %v560_v26, 0.0 }
 0x157   : > { %v577_v33 = vmax.f32 %v571_v29, 0.0 }
 0x158   : > { %v575_v35 = vmax.f32 %v563_v31, 0.0  ;;  %v1035_v39 = vpop.permute.xlu1 %1034 }
 0x159   : > { %v583_v36 = vpack.c.bf16 %v577_v33, %v576_v32 }
 0x15a   : > { %v582_v37 = vpack.c.bf16 %v575_v35, %v574_v34 }
 0x15c   : > { %1499 = vmatprep.subr.bf16.mxu1 %v582_v37 }
 0x15d   : > { %1500 = vmatpush3.bf16.msra.mxu1 %v582_v37  ;;  %v1600_v37 = vld [vmem:[%s1878_s2 + $0x40] sm:$0xff]  }
 0x15e   : > { %1501 = vmatprep.subr.bf16.mxu1 %v583_v36 }
 0x161   : > { %1502 = vmatpush3.bf16.msra.mxu1 %v583_v36  ;;  %v1599_v36 = vld [vmem:[%s1878_s2 + $0x38] sm:$0xff]  }
 0x164   : > { %1504 = vmatmul.mubr.msk.bf16.vlgmr.msra.gmra.mrb[0].mxu1 %vm619_vm2, %v1591_v38  ;;  %v1030_v38 = vpop.permute.xlu0 %1029 }
 0x165   : > { %1519 = vmatprep.mubr.msk.bf16.mxu1 %vm619_vm2, %v1594_v58 }
 0x237   : > { %v1505_v43 = vpop.f32.mrb[0].mxu1 }
 0x238   : > { %v669_v44 = vadd.f32 %v1505_v43, %v602_v42  ;;  %v660_v45 = vpop.f32.mrb[1].mxu1 }
 0x239   : > { %v661_v47 = vadd.f32 %v660_v45, %v592_v40  ;;  %v1506_v48 = vpop.f32.mrb[2].mxu1  ;;  %v1040_v40 = vpop.permute.xlu0 %1039 }
 0x23a   : > { %v672_v49 = vadd.f32 %v1506_v48, %v607_v46  ;;  %v663_v50 = vpop.f32.mrb[3].mxu1  ;;  %v677_v52 = vmax.f32 %v669_v44, 0.0  ;;  %v1045_v44 = vpop.permute.xlu1 %1044 }
 0x23b   : > { %v664_v51 = vadd.f32 %v663_v50, %v597_v41  ;;  %v675_v54 = vmax.f32 %v661_v47, 0.0 }
 0x23c   : > { %v678_v53 = vmax.f32 %v672_v49, 0.0 }
 0x23d   : > { %v676_v55 = vmax.f32 %v664_v51, 0.0 }
 0x23e   : > { %v685_v56 = vpack.c.bf16 %v678_v53, %v677_v52  ;;  %v1075_v58 = vpop.permute.xlu1 %1074 }
 0x23f   : > { %v684_v57 = vpack.c.bf16 %v676_v55, %v675_v54 }
 0x241   : > { %1507 = vmatprep.subr.bf16.mxu0 %v684_v57 }
 0x242   : > { %1508 = vmatpush3.bf16.msra.mxu0 %v684_v57  ;;  %v1602_v57 = vld [vmem:[%s1878_s2 + $0x50] sm:$0xff]  }
 0x243   : > { %1509 = vmatprep.subr.bf16.mxu0 %v685_v56 }
 0x246   : > { %1510 = vmatpush3.bf16.msra.mxu0 %v685_v56  ;;  %v1601_v56 = vld [vmem:[%s1878_s2 + $0x48] sm:$0xff]  }
 0x247   : > { %1523 = vmatprep.subr.bf16.mxu0 %v479_v17 }
 0x249   : > { %1512 = vmatmul.mubr.msk.bf16.vlgmr.msra.gmra.mrb[4].mxu0 %vm619_vm2, %v1593_v8  ;;  %v1070_v8 = vpop.permute.xlu0 %1069 }
 0x24a   : > { %1524 = vmatpush3.bf16.msra.mxu0 %v479_v17  ;;  %1525 = vmatprep.mubr.msk.bf16.mxu0 %vm518_vm0, %v1596_v15  ;;  %v1598_v17 = vld [vmem:[%s1878_s2 + $0x30] sm:$0xff]  }
 0x251   : > { %1526 = vmatmul.mubr.msk.bf16.vlgmr.msra.gmra.mrb[8].mxu0 %vm518_vm0, %v1597_v16  ;;  %vm1626_vm0 = vmmov 0  }
 0x252   : > { %1533 = vmatprep.mubr.msk.bf16.mxu0 %vm619_vm2, %v1598_v17 }
 0x31c   : > { %v1513_v62 = vpop.f32.mrb[4].mxu0 }
 0x31d   : > { %v770_v63 = vadd.f32 %v1513_v62, %v704_v61  ;;  %v761_v0 = vpop.f32.mrb[5].mxu0 }
 0x31e   : > { %v762_v2 = vadd.f32 %v761_v0, %v694_v59  ;;  %v1514_v3 = vpop.f32.mrb[6].mxu0  ;;  %v1080_v59 = vpop.permute.xlu0 %1079 }
 0x31f   : > { %v773_v4 = vadd.f32 %v1514_v3, %v709_v1  ;;  %v764_v6 = vpop.f32.mrb[7].mxu0  ;;  %v778_v9 = vmax.f32 %v770_v63, 0.0  ;;  %v1085_v63 = vpop.permute.xlu1 %1084 }
 0x320   : > { %v765_v7 = vadd.f32 %v764_v6, %v699_v60  ;;  %v776_v5 = vmax.f32 %v762_v2, 0.0 }
 0x321   : > { %v779_v10 = vmax.f32 %v773_v4, 0.0 }
 0x322   : > { %v777_v11 = vmax.f32 %v765_v7, 0.0 }
 0x323   : > { %v786_v12 = vpack.c.bf16 %v779_v10, %v778_v9  ;;  %v1176_v15 = vpop.permute.xlu1 %1175 }
 0x324   : > { %v785_v13 = vpack.c.bf16 %v777_v11, %v776_v5 }
 0x326   : > { %1515 = vmatprep.subr.bf16.mxu1 %v785_v13 }
 0x327   : > { %1516 = vmatpush3.bf16.msra.mxu1 %v785_v13  ;;  %v1625_v13 = vmov 0.0  }
 0x328   : > { %1517 = vmatprep.subr.bf16.mxu1 %v786_v12 }
 0x32b   : > { %1518 = vmatpush3.bf16.msra.mxu1 %v786_v12  ;;  %v1603_v12 = vld [vmem:[%s1878_s2 + $0x58] sm:$0xff]  }
 0x32e   : > { %1520 = vmatmul.mubr.msk.bf16.vlgmr.msra.gmra.mrb[4].mxu1 %vm619_vm2, %v1595_v14  ;;  %v1171_v14 = vpop.permute.xlu0 %1170 }
 0x32f   : > { %1541 = vmatprep.mubr.msk.bf16.mxu1 %vm619_vm2, %v1600_v37 }
 0x332   : > { %v1181_v16 = vpop.permute.xlu0 %1180 }
 0x401   : > { %v1521_v21 = vpop.f32.mrb[4].mxu1 }
 0x402   : > { %v871_v22 = vadd.f32 %v1521_v21, %v805_v20  ;;  %v862_v23 = vpop.f32.mrb[5].mxu1  ;;  %v1186_v20 = vpop.permute.xlu1 %1185 }
 0x403   : > { %v863_v25 = vadd.f32 %v862_v23, %v795_v18  ;;  %v1522_v26 = vpop.f32.mrb[6].mxu1 }
 0x404   : > { %v874_v27 = vadd.f32 %v1522_v26, %v810_v24  ;;  %v865_v28 = vpop.f32.mrb[7].mxu1  ;;  %v879_v30 = vmax.f32 %v871_v22, 0.0 }
 0x405   : > { %v866_v29 = vadd.f32 %v865_v28, %v800_v19  ;;  %v877_v32 = vmax.f32 %v863_v25, 0.0 }
 0x406   : > { %v880_v31 = vmax.f32 %v874_v27, 0.0 }
 0x407   : > { %v878_v33 = vmax.f32 %v866_v29, 0.0 }
 0x408   : > { %v887_v34 = vpack.c.bf16 %v880_v31, %v879_v30 }
 0x409   : > { %v886_v35 = vpack.c.bf16 %v878_v33, %v877_v32  ;;  %v1257_v32 = vld [vmem:[%s1880_s4] sm:$0x3]  ;;  %v1265_v33 = vpop.permute.xlu0 %1264 }
 0x40b   : > { %1529 = vmatprep.subr.bf16.mxu0 %v886_v35 }
 0x40c   : > { %1530 = vmatpush3.bf16.msra.mxu0 %v886_v35 }
 0x40d   : > { %1531 = vmatprep.subr.bf16.mxu0 %v887_v34 }
 0x410   : > { %1532 = vmatpush3.bf16.msra.mxu0 %v887_v34 }
 0x411   : > { %1553 = vmatprep.subr.bf16.mxu0 %v1625_v13 }
 0x413   : > { %1534 = vmatmul.mubr.msk.bf16.vlgmr.msra.gmra.mrb[8].mxu0 %vm619_vm2, %v1599_v36 }
 0x414   : > { %1557 = vmatprep.mubr.msk.bf16.mxu0 %vm1626_vm0, %v1625_v13 }
 0x4e6   : > { %v1535_v41 = vpop.f32.mrb[8].mxu0 }
 0x4e7   : > { %v1049_v42 = vadd.f32 %v1535_v41, %v1040_v40  ;;  %v1007_v43 = vpop.f32.mrb[9].mxu0 }
 0x4e8   : > { %v1047_v45 = vadd.f32 %v1030_v38, %v1007_v43  ;;  %v1536_v46 = vpop.f32.mrb[10].mxu0 }
 0x4e9   : > { %v1050_v47 = vadd.f32 %v1536_v46, %v1045_v44  ;;  %v1010_v48 = vpop.f32.mrb[11].mxu0  ;;  %v1053_v50 = vmax.f32 %v1049_v42, 0.0 }
 0x4ea   : > { %v1048_v49 = vadd.f32 %v1035_v39, %v1010_v48  ;;  %v1051_v52 = vmax.f32 %v1047_v45, 0.0 }
 0x4eb   : > { %v1054_v51 = vmax.f32 %v1050_v47, 0.0 }
 0x4ec   : > { %v1052_v53 = vmax.f32 %v1048_v49, 0.0 }
 0x4ed   : > { %v1061_v54 = vpack.c.bf16 %v1054_v51, %v1053_v50 }
 0x4ee   : > { %v1060_v55 = vpack.c.bf16 %v1052_v53, %v1051_v52 }
 0x4f0   : > { %1537 = vmatprep.subr.bf16.mxu1 %v1060_v55 }
 0x4f1   : > { %1538 = vmatpush3.bf16.msra.mxu1 %v1060_v55 }
 0x4f2   : > { %1539 = vmatprep.subr.bf16.mxu1 %v1061_v54 }
 0x4f5   : > { %1540 = vmatpush3.bf16.msra.mxu1 %v1061_v54 }
 0x4f8   : > { %1542 = vmatmul.mubr.msk.bf16.vlgmr.msra.gmra.mrb[8].mxu1 %vm619_vm2, %v1601_v56 }
 0x4f9   : > { %1549 = vmatprep.mubr.msk.bf16.mxu1 %vm619_vm2, %v1602_v57 }
 0x5cb   : > { %v1543_v60 = vpop.f32.mrb[8].mxu1 }
 0x5cc   : > { %v1146_v61 = vadd.f32 %v1543_v60, %v1080_v59  ;;  %v1137_v62 = vpop.f32.mrb[9].mxu1 }
 0x5cd   : > { %v1138_v0 = vadd.f32 %v1137_v62, %v1070_v8  ;;  %v1544_v1 = vpop.f32.mrb[10].mxu1 }
 0x5ce   : > { %v1149_v2 = vadd.f32 %v1544_v1, %v1085_v63  ;;  %v1140_v3 = vpop.f32.mrb[11].mxu1  ;;  %v1154_v6 = vmax.f32 %v1146_v61, 0.0 }
 0x5cf   : > { %v1141_v4 = vadd.f32 %v1140_v3, %v1075_v58  ;;  %v1152_v9 = vmax.f32 %v1138_v0, 0.0 }
 0x5d0   : > { %v1155_v7 = vmax.f32 %v1149_v2, 0.0 }
 0x5d1   : > { %v1153_v10 = vmax.f32 %v1141_v4, 0.0 }
 0x5d2   : > { %v1162_v5 = vpack.c.bf16 %v1155_v7, %v1154_v6 }
 0x5d3   : > { %v1161_v11 = vpack.c.bf16 %v1153_v10, %v1152_v9 }
 0x5d5   : > { %1545 = vmatprep.subr.bf16.mxu1 %v1161_v11 }
 0x5d6   : > { %1546 = vmatpush3.bf16.msra.mxu1 %v1161_v11 }
 0x5d7   : > { %1547 = vmatprep.subr.bf16.mxu1 %v1162_v5 }
 0x5da   : > { %1548 = vmatpush3.bf16.msra.mxu1 %v1162_v5 }
 0x5dd   : > { %1550 = vmatmul.mubr.msk.bf16.vlgmr.msra.gmra.mrb[12].mxu1 %vm619_vm2, %v1603_v12 }
 0x6b0   : > { %v1551_v17 = vpop.f32.mrb[12].mxu1 }
 0x6b1   : > { %v1247_v18 = vadd.f32 %v1551_v17, %v1181_v16  ;;  %v1238_v19 = vpop.f32.mrb[13].mxu1 }
 0x6b2   : > { %v1239_v21 = vadd.f32 %v1238_v19, %v1171_v14  ;;  %v1552_v22 = vpop.f32.mrb[14].mxu1 }
 0x6b3   : > { %v1250_v23 = vadd.f32 %v1552_v22, %v1186_v20  ;;  %v1241_v24 = vpop.f32.mrb[15].mxu1  ;;  %v1255_v26 = vmax.f32 %v1247_v18, 0.0 }
 0x6b4   : > { %v1242_v25 = vadd.f32 %v1241_v24, %v1176_v15  ;;  %v1253_v28 = vmax.f32 %v1239_v21, 0.0 }
 0x6b5   : > { %v1256_v27 = vmax.f32 %v1250_v23, 0.0 }
 0x6b6   : > { %v1254_v29 = vmax.f32 %v1242_v25, 0.0 }
 0x6b7   : > { %v1259_v30 = vpack.c.bf16 %v1256_v27, %v1255_v26 }
 0x6b8   : > { %v1258_v31 = vpack.c.bf16 %v1254_v29, %v1253_v28 }
 0x6ba   : > { %1554 = vmatpush3.bf16.msra.mxu0 %v1258_v31 }
 0x6bb   : > { %1555 = vmatprep.subr.bf16.mxu0 %v1625_v13 }
 0x6be   : > { %1556 = vmatpush3.bf16.msra.mxu0 %v1259_v30 }
 0x6c1   : > { %1558 = vmatmul.mubr.msk.bf16.vlgmr.msra.gmra.mrb[12].mxu0 %vm619_vm2, %v1257_v32 }
 0x794   : > { %v1304_v34 = vpop.f32.mrb[12].mxu0 }
 0x795   : > { %v1305_v35 = vadd.f32 %v1304_v34, %v1265_v33  ;;  %v1559_v36 = vpop.f32.mrb[13].mxu0 }
 0x796   : > { %v1307_v37 = vpop.f32.mrb[14].mxu0 }
 0x797   : > { %1608 = vtanh.f32 %v1305_v35  ;;  %v1560_v38 = vpop.f32.mrb[15].mxu0 }
 0x7a1   : > { %v1609_v39 = vpop.eup %1608 }
 0x7a2   : > { %1311 = vst [vmem:[%s246_s10] sm:$0x7] %v1609_v39 }
 0x7a3 PF: > { %s16_s21 = sadd.s32 1, %s1616_s21  }
 0x7a4   : > { %p13_p4 = scmp.ge.s32.totalorder %s16_s21, 4  }
 0x7a6   :  { %15 = sbr.rel (!%p13_p4) target bundleno = 1 (0x1), region = 86 }

</bundles_post_ra>
